<compile_context>
chip_gen: v5e
topology: v5e:2x2
jax: 0.10.0
libtpu: 0.0.40
codegen_flags: <defaults>
</compile_context>

<pallas_src>
import functools
import math

import jax
import jax.numpy as jnp
from jax import lax
from jax.experimental import pallas as pl
from jax.experimental.pallas import tpu as pltpu

_PAD_LABEL = int(jnp.iinfo(jnp.int32).min)


def _round_up(x, m):
    return (x + m - 1) // m * m


def _pick_block(batch):
    if batch <= 128:
        return _round_up(max(batch, 8), 8)
    if batch >= 1024:
        return 256
    return 128


# ---------------------------------------------------------------------------
# Kernel 1: row-wise L2 normalization + temperature folding + bf16 cast.
# ---------------------------------------------------------------------------
def _normalize_kernel(x_ref, o_ref, *, inv_sqrt_temp):
    x = x_ref[...]                                         # (bt, Dp) f32
    ss = jnp.sum(x * x, axis=1, keepdims=True)             # (bt, 1)
    # F.normalize semantics: x / max(||x||, 1e-12); reciprocal on the EUP.
    inv = pl.reciprocal(jnp.maximum(jnp.sqrt(ss), 1e-12), approx=True)
    o_ref[...] = (x * (inv * inv_sqrt_temp)).astype(o_ref.dtype)


def _normalize_scaled(f_pad, temperature, block):
    bp, dp = f_pad.shape
    kernel = functools.partial(
        _normalize_kernel, inv_sqrt_temp=1.0 / math.sqrt(temperature))
    return pl.pallas_call(
        kernel,
        out_shape=jax.ShapeDtypeStruct((bp, dp), jnp.bfloat16),
        grid=(bp // block,),
        in_specs=[pl.BlockSpec((block, dp), lambda i: (i, 0))],
        out_specs=pl.BlockSpec((block, dp), lambda i: (i, 0)),
        compiler_params=pltpu.CompilerParams(dimension_semantics=("parallel",)),
    )(f_pad)


# ---------------------------------------------------------------------------
# Kernel 2: tiled, streaming SupCon core (online log-sum-exp over key tiles).
# ---------------------------------------------------------------------------
def _supcon_tile_kernel(q_ref, k_ref, labq_ref, labk_ref, out_ref,
                        m_scr, l_scr, ms_scr, np_scr, *, n_pad):
    qi = pl.program_id(0)
    ki = pl.program_id(1)
    nk = pl.num_programs(1)

    @pl.when(ki == 0)
    def _init():
        m_scr[...] = jnp.full_like(m_scr, -jnp.inf)
        l_scr[...] = jnp.zeros_like(l_scr)
        ms_scr[...] = jnp.zeros_like(ms_scr)
        np_scr[...] = jnp.zeros_like(np_scr)

    # (T, T) similarity tile on the MXU; 1/temperature is already folded into
    # the bf16 operands, accumulation in f32.
    s = lax.dot_general(
        q_ref[...], k_ref[...],
        dimension_numbers=(((1,), (1,)), ((), ())),
        preferred_element_type=jnp.float32)

    # Positives (label match) for this tile; numerator terms are linear in s,
    # so no max-rescaling is needed for them.
    pos = labq_ref[...] == labk_ref[...]                   # (T,1)==(1,T) -> (T,T)
    ms_scr[...] += jnp.sum(jnp.where(pos, s, 0.0), axis=1, keepdims=True)
    np_scr[...] += jnp.sum(pos.astype(jnp.float32), axis=1, keepdims=True)

    # Online log-sum-exp accumulation across key tiles.
    m_prev = m_scr[...]
    l_prev = l_scr[...]
    m_cur = jnp.maximum(m_prev, jnp.max(s, axis=1, keepdims=True))
    alpha = jnp.exp(m_prev - m_cur)
    p = jnp.exp(s - m_cur)
    m_scr[...] = m_cur

    @pl.when(qi != ki)
    def _offdiag():
        l_scr[...] = alpha * l_prev + jnp.sum(p, axis=1, keepdims=True)

    @pl.when(qi == ki)
    def _diag():
        # Exclude the self-similarity term from the denominator, using the
        # exactly computed diagonal entry (only traversed on diagonal tiles).
        r = lax.broadcasted_iota(jnp.int32, p.shape, 0)
        c = lax.broadcasted_iota(jnp.int32, p.shape, 1)
        p_noself = jnp.where(r == c, 0.0, p)
        l_scr[...] = alpha * l_prev + jnp.sum(p_noself, axis=1, keepdims=True)

    @pl.when(ki == nk - 1)
    def _finalize():
        m = m_scr[...]
        z = l_scr[...]
        if n_pad:
            # Zero-padded rows normalize to exactly 0, so every padded key
            # column contributed exactly exp(0 - m) to the denominator.
            z = z - float(n_pad) * jnp.exp(-m)
        # mean_log_prob_pos = sum(mask*sim)/N_pos - m - log(Z + 1e-12)
        out_ref[...] = ms_scr[...] / np_scr[...] - m - jnp.log(z + 1e-12)


# ---------------------------------------------------------------------------
# Wrapper.
# ---------------------------------------------------------------------------
def _pad_inputs(features, labels, block):
    b, d = features.shape
    bp = _round_up(b, block)
    dp = _round_up(d, 128)
    f = features.astype(jnp.float32)
    if (bp, dp) != (b, d):
        f = jnp.pad(f, ((0, bp - b), (0, dp - d)))
    lab = labels.astype(jnp.int32).reshape(-1)
    if bp != b:
        lab = jnp.pad(lab, (0, bp - b), constant_values=_PAD_LABEL)
    return f, lab, bp - b


def supcon_loss(features, labels, temperature=0.07, block_size=None):
    """features: [B, D] float, labels: [B] int.  Returns scalar float32 loss."""
    b = features.shape[0]
    block = block_size if block_size is not None else _pick_block(b)
    f_pad, lab_pad, n_pad = _pad_inputs(features, labels, block)
    bp, dp = f_pad.shape

    xn = _normalize_scaled(f_pad, temperature, block)      # (Bp, Dp) bf16

    lab_col = lab_pad.reshape(bp, 1)
    lab_row = lab_pad.reshape(1, bp)
    n_tiles = bp // block

    mlpp = pl.pallas_call(
        functools.partial(_supcon_tile_kernel, n_pad=n_pad),
        out_shape=jax.ShapeDtypeStruct((bp, 1), jnp.float32),
        grid=(n_tiles, n_tiles),
        in_specs=[
            pl.BlockSpec((block, dp), lambda qi, ki: (qi, 0)),   # query rows
            pl.BlockSpec((block, dp), lambda qi, ki: (ki, 0)),   # key rows (streamed)
            pl.BlockSpec((block, 1), lambda qi, ki: (qi, 0)),    # labels (column)
            pl.BlockSpec((1, block), lambda qi, ki: (0, ki)),    # labels (row)
        ],
        out_specs=pl.BlockSpec((block, 1), lambda qi, ki: (qi, 0)),
        scratch_shapes=[pltpu.VMEM((block, 1), jnp.float32)] * 4,
        compiler_params=pltpu.CompilerParams(
            dimension_semantics=("parallel", "arbitrary")),
    )(xn, xn, lab_col, lab_row)

    return -jnp.mean(mlpp[:b, 0])


# ---------------------------------------------------------------------------
# Pure-JAX references (for the correctness check).
# ---------------------------------------------------------------------------
def _supcon_ref(features, labels, temperature=0.07):
    """f32 reference mirroring the PyTorch module."""
    x = features / jnp.maximum(
        jnp.sqrt(jnp.sum(features * features, axis=1, keepdims=True)), 1e-12)
    b = x.shape[0]
    mask = (labels.reshape(-1, 1) == labels.reshape(1, -1)).astype(jnp.float32)
    adc = (x @ x.T) / temperature
    logits = adc - jnp.max(adc, axis=1, keepdims=True)
    exp_logits = jnp.exp(logits) * (1.0 - jnp.eye(b, dtype=jnp.float32))
    log_prob = logits - jnp.log(jnp.sum(exp_logits, axis=1, keepdims=True) + 1e-12)
    mlpp = jnp.sum(mask * log_prob, axis=1) / jnp.sum(mask, axis=1)
    return -jnp.mean(mlpp)


def _supcon_ref_from_scaled(xn_scaled, labels):
    """Same formula, starting from already-normalized, 1/sqrt(T)-scaled features."""
    b = xn_scaled.shape[0]
    mask = (labels.reshape(-1, 1) == labels.reshape(1, -1)).astype(jnp.float32)
    adc = xn_scaled @ xn_scaled.T
    logits = adc - jnp.max(adc, axis=1, keepdims=True)
    exp_logits = jnp.exp(logits) * (1.0 - jnp.eye(b, dtype=jnp.float32))
    log_prob = logits - jnp.log(jnp.sum(exp_logits, axis=1, keepdims=True) + 1e-12)
    mlpp = jnp.sum(mask * log_prob, axis=1) / jnp.sum(mask, axis=1)
    return -jnp.mean(mlpp)


if __name__ == "__main__":
    temperature = 0.07
    key = jax.random.PRNGKey(0)

    for (b, d, n_cls) in [(8, 32, 3), (12, 48, 4)]:
        key, kf, kl = jax.random.split(key, 3)
        features = jax.random.normal(kf, (b, d), dtype=jnp.float32)
        labels = jax.random.randint(kl, (b,), 0, n_cls, dtype=jnp.int32)

        loss = jax.block_until_ready(supcon_loss(features, labels, temperature))

        # Reference built from the exact bf16 operand the kernel feeds the MXU.
        block = _pick_block(b)
        f_pad, _, _ = _pad_inputs(features, labels, block)
        xn = _normalize_scaled(f_pad, temperature, block).astype(jnp.float32)[:b]
        ref_matched = jax.block_until_ready(_supcon_ref_from_scaled(xn, labels))

        # Pure-f32 reference of the original module.
        ref_f32 = jax.block_until_ready(_supcon_ref(features, labels, temperature))

        assert jnp.allclose(loss, ref_matched, atol=2e-3, rtol=1e-3), (
            b, float(loss), float(ref_matched))
        # bf16 MXU operands perturb the similarities slightly vs the f32 reference.
        assert jnp.allclose(loss, ref_f32, atol=0.15, rtol=0.05), (
            b, float(loss), float(ref_f32))

    print("KERNEL_OK")
</pallas_src>

<mosaic_0001>
module attributes {stable_mosaic.version = 11 : i64} {
  func.func @_normalize_kernel(%arg0: i32, %arg1: memref<8x128xf32, #tpu.memory_space<vmem>>, %arg2: memref<8x128xbf16, #tpu.memory_space<vmem>>) attributes {dimension_semantics = [#tpu.dimension_semantics<parallel>], iteration_bounds = array<i64: 1>, scalar_prefetch = 0 : i64, scratch_operands = 0 : i64, tpu.core_type = #tpu.core_type<tc>, window_params = [{transform_indices = @transform_0, window_bounds = array<i64: 8, 128>}, {transform_indices = @transform_1, window_bounds = array<i64: 8, 128>}]} {
    %c0 = arith.constant 0 : index
    %c0_0 = arith.constant 0 : index
    %0 = vector.load %arg1[%c0, %c0_0] : memref<8x128xf32, #tpu.memory_space<vmem>>, vector<8x128xf32>
    %1 = arith.mulf %0, %0 : vector<8x128xf32>
    %cst = arith.constant dense<0.000000e+00> : vector<8xf32>
    %2 = vector.multi_reduction <add>, %1, %cst [1] : vector<8x128xf32> to vector<8xf32>
    %3 = vector.shape_cast %2 : vector<8xf32> to vector<8x1xf32>
    %4 = math.sqrt %3 : vector<8x1xf32>
    %cst_1 = arith.constant 9.99999996E-13 : f32
    %5 = vector.broadcast %cst_1 : f32 to vector<8x1xf32>
    %6 = arith.maximumf %4, %5 : vector<8x1xf32>
    %7 = tpu.reciprocal %6 {approx = true} : vector<8x1xf32> -> vector<8x1xf32>
    %cst_2 = arith.constant 3.77964473 : f32
    %8 = vector.broadcast %cst_2 : f32 to vector<8x1xf32>
    %9 = arith.mulf %7, %8 : vector<8x1xf32>
    %10 = vector.broadcast %9 : vector<8x1xf32> to vector<8x128xf32>
    %11 = arith.mulf %0, %10 : vector<8x128xf32>
    %12 = arith.truncf %11 : vector<8x128xf32> to vector<8x128xbf16>
    %c0_3 = arith.constant 0 : index
    %c0_4 = arith.constant 0 : index
    %13 = vector.load %arg2[%c0_3, %c0_4] : memref<8x128xbf16, #tpu.memory_space<vmem>>, vector<8x128xbf16>
    tpu.vector_store %arg2[%c0_3, %c0_4], %12 {strides = array<i32>} : memref<8x128xbf16, #tpu.memory_space<vmem>>, vector<8x128xbf16>,
    return
  }
  func.func @transform_0(%arg0: i32) -> (i32, i32) {
    %c0_i32 = arith.constant 0 : i32
    %c0_i32_0 = arith.constant 0 : i32
    return %arg0, %c0_i32 : i32, i32
  }
  func.func @transform_1(%arg0: i32) -> (i32, i32) {
    %c0_i32 = arith.constant 0 : i32
    %c0_i32_0 = arith.constant 0 : i32
    return %arg0, %c0_i32 : i32, i32
  }
}

</mosaic_0001>

<bundles_post_ra>
// kernel: tpu_custom_call.1
= control target key start
LH: loop header
LB: loop body
LE: loop exit
PB: predicated region body
PF: predicated region fallthrough
CT: control target
= control target key end

     0   :  { %6 = vsyncpa [#allocation3], 0  ;;  %s138_s0 = inlined_call_operand.hbm [shape: f32[8,128], index: 0, kind: input, shape index: {}]   ;;  %s139_s1 = inlined_call_operand.hbm [shape: bf16[8,128], index: 1, kind: output, shape index: {}]  }
   0x1   :  { %7 = vsyncpa [#allocation4], 0  ;;  %s13_s8 = sshll.u32 %s138_s0, 4  ;;  %s120_s9 = smov [#allocation2]   ;;  %s14_s8 = int_to_ptr.hbm [resolvable:$true] %s13_s8 }
   0x2   :  { %s15_s10 = sshll.u32 %s120_s9, 4  ;;  %s16_s10 = int_to_ptr.vmem [resolvable:$true] %s15_s10 }
   0x3   :  { %18 = dma.hbm_to_vmem [thread:$0]  %s14_s8, 128, %s16_s10, [#allocation3]  }
   0x4   :  { %116 = dma.done.wait [#allocation3], 128  }
   0x5   :  { %117 = vsyncadd [#allocation3], 4294967168  ;;  %v23_v0 = vld [vmem:[#allocation2] sm:$0xff]  ;;  %s121_s0 = smov [#allocation5]   ;;  %s52_s14 = sshll.u32 %s139_s1, 4  ;;  %s53_s14 = int_to_ptr.hbm [resolvable:$true] %s52_s14 }
   0x6   :  { %v24_v1 = vmul.f32 %v23_v0, %v23_v0  ;;  %s50_s11 = sshll.u32 %s121_s0, 4  ;;  %s51_s11 = int_to_ptr.vmem [resolvable:$true] %s50_s11 }
   0x8   :  { %25 = vadd.xlane.f32.xlu0 %v24_v1 }
  0x7b   :  { %v26_v2 = vpop.xlane.xlu0 %25 }
  0x7c   :  { %64 = vrsqrt.f32 %v26_v2  ;;  %vm34_vm0 = vcmp.eq.f32.partialorder %v26_v2, inf  ;;  %v37_v10 = vand.u32 2147483648, %v26_v2  ;;  %vm36_vm1 = vcmp.eq.f32.partialorder %v26_v2, 0.0 }
  0x82   :  { %v65_v3 = vpop.eup %64 }
  0x83   :  { %v28_v4 = vmul.f32 %v65_v3, %v26_v2 }
  0x85   :  { %v29_v5 = vmul.f32 %v65_v3, %v28_v4 }
  0x87   :  { %v30_v6 = vmul.f32 0.5, %v29_v5 }
  0x89   :  { %v31_v7 = vsub.f32 1.5, %v30_v6 }
  0x8b   :  { %v32_v8 = vmul.f32 %v65_v3, %v31_v7 }
  0x8d   :  { %v33_v9 = vmul.f32 %v32_v8, %v26_v2 }
  0x8f   :  { %v35_v11 = vsel %vm34_vm0, %v26_v2, %v33_v9 }
  0x90   :  { %v38_v12 = vsel %vm36_vm1, %v37_v10, %v35_v11 }
  0x91   :  { %v39_v13 = vmax.f32 %v38_v12, 1e-12 }
  0x93   :  { %66 = vrcp.f32 %v39_v13 }
  0x99   :  { %v67_v14 = vpop.eup %66 }
  0x9a   :  { %v41_v15 = vmul.f32 3.7796447, %v67_v14 }
  0x9c   :  { %v42_v16 = vmul.f32 %v41_v15, %v23_v0 }
  0x9e   :  { %v43_v17 = vpack.c.bf16 %v42_v16, %v42_v16 }
  0xa0   :  { %44 = vst [vmem:[#allocation5] sm:$0xf] %v43_v17 }
  0xa1   :  { %55 = dma.vmem_to_hbm [thread:$0]  %s51_s11, 64, %s53_s14, [#allocation4]  }
  0xa2   :  { %118 = dma.done.wait [#allocation4], 64  }
  0xa3   :  { %119 = vsyncadd [#allocation4], 4294967232 }
  0xa4   :  { %60 = vsyncpa [#allocation3], 1 }
  0xa5   :  { %61 = vsyncpa [#allocation4], 1 }

</bundles_post_ra>
